<compile_context>
chip_gen: v5e
topology: v5e:2x2
jax: 0.10.0
libtpu: 0.0.40
codegen_flags: <defaults>
</compile_context>

<pallas_src>
import jax
import jax.numpy as jnp
from jax.experimental import pallas as pl
from jax.experimental.pallas import tpu as pltpu


# ---------------------------------------------------------------------------
# Pallas kernel (query path + attention + out projection; k/v are hoisted)
# ---------------------------------------------------------------------------
def _self_attn_kernel(
    xq_ref,            # (1, Cq, TN)   activations
    kT_ref,            # (1, K,  Ct)   precomputed, pre-scaled, pre-transposed key
    v_ref,             # (1, Ct, K)    precomputed value
    wq1_ref, bq1_ref,  # (Ct, Cq), (Ct, 1)
    wq2_ref, bq2_ref,  # (Ct, Ct), (Ct, 1)
    wo1_ref, bo1_ref,  # (Cout, Ct), (Cout, 1)
    out_ref,           # (1, Cout, TN)
):
  cdt = wq1_ref.dtype  # MXU operand dtype (bf16 by default, f32 optional)

  def proj_t(x_t, w_ref, b_ref):
    # channel-first 1x1 conv (bias=False) + folded BN + ReLU: relu(W @ x^T + b)
    y = jnp.dot(w_ref[...], x_t.astype(cdt),
                preferred_element_type=jnp.float32)          # f32 accumulate
    return jnp.maximum(y + b_ref[...], 0.0)                  # (c_out, n) f32

  xq_t = xq_ref[0]                                           # (Cq, TN)
  q_t = proj_t(proj_t(xq_t, wq1_ref, bq1_ref), wq2_ref, bq2_ref)   # (Ct, TN) f32

  # sim^T[k, n] = sum_c k[c, k] * q[c, n]  -> (K, TN), lane-dense.
  # kT is already (K, Ct), already scaled by 1/sqrt(Ct): no .T, no mul here.
  sim_t = jnp.dot(kT_ref[0], q_t.astype(cdt),
                  preferred_element_type=jnp.float32)        # (K, TN)

  # Softmax over the K (sublane) axis; fully resident, f32.
  m = jnp.max(sim_t, axis=0, keepdims=True)                  # (1, TN)
  p = jnp.exp(sim_t - m)                                     # (K, TN)
  denom = jnp.sum(p, axis=0, keepdims=True)                  # (1, TN)
  inv = pl.reciprocal(denom, approx=True)                    # EUP slot
  inv = inv * (2.0 - denom * inv)                            # 1 Newton step -> ~f32 accuracy
  p = p * inv

  ctx_t = jnp.dot(v_ref[0], p.astype(cdt),
                  preferred_element_type=jnp.float32)        # (Ct, TN)
  out_ref[0] = proj_t(ctx_t, wo1_ref, bo1_ref).astype(out_ref.dtype)


# ---------------------------------------------------------------------------
# Parameter construction (deterministic, BN folded in eval mode)
# ---------------------------------------------------------------------------
def _fold_conv_bn(key, c_in, c_out, eps=1e-5):
  """1x1 conv (c_out, c_in) + eval-mode BN, folded.

  Returns W_folded (c_out, c_in) in native conv layout (used directly by the
  channel-first dataflow) and b_folded (c_out, 1).
  """
  kw, kg, kb, km, kv = jax.random.split(key, 5)
  w = jax.random.normal(kw, (c_out, c_in), jnp.float32) * 0.1
  gamma = 1.0 + 0.1 * jax.random.normal(kg, (c_out,), jnp.float32)
  beta = 0.1 * jax.random.normal(kb, (c_out,), jnp.float32)
  mean = 0.1 * jax.random.normal(km, (c_out,), jnp.float32)
  var = jnp.abs(jax.random.normal(kv, (c_out,), jnp.float32)) + 0.5
  s = gamma / jnp.sqrt(var + eps)
  w_f = w * s[:, None]                # (c_out, c_in)
  b_f = (beta - mean * s)[:, None]    # (c_out, 1)
  return w_f, b_f


def make_params(key, key_in, query_in, transform, out_ch):
  ks = jax.random.split(key, 6)
  wq1, bq1 = _fold_conv_bn(ks[0], query_in, transform)
  wq2, bq2 = _fold_conv_bn(ks[1], transform, transform)
  wk1, bk1 = _fold_conv_bn(ks[2], key_in, transform)
  wk2, bk2 = _fold_conv_bn(ks[3], transform, transform)
  wv1, bv1 = _fold_conv_bn(ks[4], key_in, transform)
  wo1, bo1 = _fold_conv_bn(ks[5], transform, out_ch)
  return (wq1, bq1, wq2, bq2, wk1, bk1, wk2, bk2, wv1, bv1, wo1, bo1)


# ---------------------------------------------------------------------------
# Wrapper
# ---------------------------------------------------------------------------
def self_attention_block(query_feats, key_feats, value_feats, params,
                         transform_channels, *, tn=2048,
                         mxu_dtype=jnp.bfloat16):
  """query_feats: (B, Cq, H, W); key/value_feats: (B, Ck, K, 1)   [NCHW].

  mxu_dtype: dtype of MXU matmul operands (weights/activations). bf16 by
  default even for f32 inputs (f32 accumulation + f32 softmax is kept); pass
  jnp.float32 for a tighter-accuracy path.
  """
  (wq1, bq1, wq2, bq2, wk1, bk1, wk2, bk2, wv1, bv1, wo1, bo1) = params
  B, Cq, H, W = query_feats.shape
  _, Ck, K, _ = key_feats.shape
  N = H * W
  Ct = transform_channels
  Cout = wo1.shape[0]
  act_dtype = query_feats.dtype
  cdt = mxu_dtype

  # --- k/v hoist: per-batch key/value projections computed once, in XLA.
  # They depend only on the batch index, so doing them inside the grid would
  # redo 5 tiny matmuls + a transpose on every N tile.  This is B*K tokens of
  # work -> negligible.  The 1/sqrt(Ct) scale is folded into wk2/bk2 (ReLU
  # commutes with a positive scalar), so the kernel has no scale multiply.
  scale = float(Ct) ** (-0.5)
  xk = key_feats.reshape(B, Ck, K).astype(jnp.float32)
  xv = value_feats.reshape(B, Ck, K).astype(jnp.float32)

  def proj(x, w, b):   # (B, C_in, M) -> (B, C_out, M)
    return jnp.maximum(jnp.einsum("oc,bcm->bom", w, x) + b[None], 0.0)

  k = proj(proj(xk, wk1, bk1), wk2 * scale, bk2 * scale)     # (B, Ct, K), pre-scaled
  v = proj(xv, wv1, bv1)                                     # (B, Ct, K)
  kT = jnp.swapaxes(k, 1, 2).astype(cdt)                     # (B, K, Ct), pre-transposed
  v = v.astype(cdt)

  # --- query activations: channel-first token layout falls out of NCHW free.
  xq = query_feats.reshape(B, Cq, N)

  # N tile (lane axis).  Big tiles amortize the ~0.35 us per-grid-step
  # overhead, which dominates at these tiny channel counts.  Pad N so every
  # tile is full -> (Cout, tn) stores are unmasked, lane-dense vst.
  n128 = -(-N // 128) * 128
  tn = max(128, min((tn // 128) * 128, n128))
  n_pad = -(-n128 // tn) * tn
  if n_pad != N:
    xq = jnp.pad(xq, ((0, 0), (0, 0), (0, n_pad - N)))
  grid = (B, n_pad // tn)

  # Weights for the in-kernel projections: matmul operands in cdt (bf16 MXU
  # path by default), biases stay f32 (added to the f32 accumulator).
  w_ops = [wq1.astype(cdt), bq1.astype(jnp.float32),
           wq2.astype(cdt), bq2.astype(jnp.float32),
           wo1.astype(cdt), bo1.astype(jnp.float32)]

  in_specs = [
      pl.BlockSpec((1, Cq, tn), lambda b, n: (b, 0, n)),
      pl.BlockSpec((1, K, Ct), lambda b, n: (b, 0, 0)),   # kT resident across n
      pl.BlockSpec((1, Ct, K), lambda b, n: (b, 0, 0)),   # v  resident across n
  ] + [pl.BlockSpec(p.shape, lambda b, n: (0, 0)) for p in w_ops]

  out_specs = pl.BlockSpec((1, Cout, tn), lambda b, n: (b, 0, n))

  out = pl.pallas_call(
      _self_attn_kernel,
      out_shape=jax.ShapeDtypeStruct((B, Cout, n_pad), act_dtype),
      grid_spec=pltpu.PrefetchScalarGridSpec(
          num_scalar_prefetch=0,
          grid=grid,
          in_specs=in_specs,
          out_specs=out_specs,
      ),
      compiler_params=pltpu.CompilerParams(
          # Both axes independent (no carried state) -> shards across the two
          # TensorCores on v7x even when B is small.
          dimension_semantics=("parallel", "parallel"),
          vmem_limit_bytes=48 * 1024 * 1024,
      ),
  )(xq, kT, v, *w_ops)

  # NCHW output: slice off lane padding, then reshape only (no transpose).
  return out[:, :, :N].reshape(B, Cout, H, W)


# ---------------------------------------------------------------------------
# Pure-JAX reference (same math as the PyTorch module, eval-mode BN folded)
# ---------------------------------------------------------------------------
def reference(query_feats, key_feats, value_feats, params, transform_channels):
  (wq1, bq1, wq2, bq2, wk1, bk1, wk2, bk2, wv1, bv1, wo1, bo1) = params
  B, Cq, H, W = query_feats.shape
  _, Ck, K, _ = key_feats.shape
  N = H * W

  def proj(x, w, b):   # x: (B, C_in, M) -> (B, C_out, M)
    return jnp.maximum(jnp.einsum("oc,bcm->bom", w, x) + b[None], 0.0)

  xq = query_feats.reshape(B, Cq, N).astype(jnp.float32)
  xk = key_feats.reshape(B, Ck, K).astype(jnp.float32)
  xv = value_feats.reshape(B, Ck, K).astype(jnp.float32)
  q = proj(proj(xq, wq1, bq1), wq2, bq2)                 # (B, Ct, N)
  k = proj(proj(xk, wk1, bk1), wk2, bk2)                 # (B, Ct, K)
  v = proj(xv, wv1, bv1)                                 # (B, Ct, K)
  sim = jnp.einsum("bcn,bck->bnk", q, k) * (transform_channels ** -0.5)
  p = jax.nn.softmax(sim, axis=-1)
  ctx = jnp.einsum("bnk,bck->bcn", p, v)                 # (B, Ct, N)
  out = proj(ctx, wo1, bo1)                              # (B, Cout, N)
  return out.reshape(B, -1, H, W)


if __name__ == "__main__":
  # Shapes consistent with the module:
  #   query_feats: (B*num_h*num_w, Cq, patch_h, patch_w)
  #   key/value_feats: (B*num_h*num_w, Ck, K, 1)
  B, Cq, Ck, H, W, K = 2, 4, 4, 16, 16, 8
  transform_channels, out_channels = 32, 32

  root = jax.random.PRNGKey(0)
  kq, kk, kv, kp = jax.random.split(root, 4)
  query_feats = jax.random.normal(kq, (B, Cq, H, W), jnp.float32)
  key_feats = jax.random.normal(kk, (B, Ck, K, 1), jnp.float32)
  value_feats = jax.random.normal(kv, (B, Ck, K, 1), jnp.float32)

  params = make_params(kp, Ck, Cq, transform_channels, out_channels)

  ref = reference(query_feats, key_feats, value_feats, params,
                  transform_channels)

  # Tight-accuracy path: f32 MXU operands.
  out_f32 = self_attention_block(query_feats, key_feats, value_feats, params,
                                 transform_channels, mxu_dtype=jnp.float32)
  out_f32 = jax.block_until_ready(out_f32)
  assert out_f32.shape == (B, out_channels, H, W)
  assert jnp.allclose(out_f32, ref, atol=1e-4, rtol=1e-4)

  # Default fast path: f32 inputs, bf16 MXU operands, f32 accumulation/softmax.
  out_fast = self_attention_block(query_feats, key_feats, value_feats, params,
                                  transform_channels)
  out_fast = jax.block_until_ready(out_fast)
  assert out_fast.shape == (B, out_channels, H, W)
  assert jnp.allclose(out_fast, ref, atol=5e-2, rtol=5e-2)

  # bf16 activations end to end (bf16 output), bf16 MXU, f32 softmax/acc.
  out_bf16 = self_attention_block(
      query_feats.astype(jnp.bfloat16), key_feats.astype(jnp.bfloat16),
      value_feats.astype(jnp.bfloat16), params, transform_channels)
  out_bf16 = jax.block_until_ready(out_bf16)
  assert out_bf16.dtype == jnp.bfloat16
  assert jnp.allclose(out_bf16.astype(jnp.float32), ref, atol=5e-2, rtol=5e-2)

  print("KERNEL_OK")
</pallas_src>

<mosaic_0001>
module attributes {stable_mosaic.version = 11 : i64} {
  func.func @_self_attn_kernel(%arg0: i32, %arg1: i32, %arg2: memref<1x4x256xf32, #tpu.memory_space<vmem>>, %arg3: memref<1x8x32xf32, #tpu.memory_space<vmem>>, %arg4: memref<1x32x8xf32, #tpu.memory_space<vmem>>, %arg5: memref<32x4xf32, #tpu.memory_space<vmem>>, %arg6: memref<32x1xf32, #tpu.memory_space<vmem>>, %arg7: memref<32x32xf32, #tpu.memory_space<vmem>>, %arg8: memref<32x1xf32, #tpu.memory_space<vmem>>, %arg9: memref<32x32xf32, #tpu.memory_space<vmem>>, %arg10: memref<32x1xf32, #tpu.memory_space<vmem>>, %arg11: memref<1x32x256xf32, #tpu.memory_space<vmem>>) attributes {dimension_semantics = [#tpu.dimension_semantics<parallel>, #tpu.dimension_semantics<parallel>], iteration_bounds = array<i64: 2, 1>, scalar_prefetch = 0 : i64, scratch_operands = 0 : i64, tpu.core_type = #tpu.core_type<tc>, window_params = [{transform_indices = @transform_0, window_bounds = array<i64: 1, 4, 256>}, {transform_indices = @transform_1, window_bounds = array<i64: 1, 8, 32>}, {transform_indices = @transform_2, window_bounds = array<i64: 1, 32, 8>}, {pipeline_mode = #tpu.pipeline_mode<synchronous>, transform_indices = @transform_3, window_bounds = array<i64: 32, 4>}, {pipeline_mode = #tpu.pipeline_mode<synchronous>, transform_indices = @transform_4, window_bounds = array<i64: 32, 1>}, {pipeline_mode = #tpu.pipeline_mode<synchronous>, transform_indices = @transform_5, window_bounds = array<i64: 32, 32>}, {pipeline_mode = #tpu.pipeline_mode<synchronous>, transform_indices = @transform_6, window_bounds = array<i64: 32, 1>}, {pipeline_mode = #tpu.pipeline_mode<synchronous>, transform_indices = @transform_7, window_bounds = array<i64: 32, 32>}, {pipeline_mode = #tpu.pipeline_mode<synchronous>, transform_indices = @transform_8, window_bounds = array<i64: 32, 1>}, {transform_indices = @transform_9, window_bounds = array<i64: 1, 32, 256>}]} {
    %c0 = arith.constant 0 : index
    %c0_0 = arith.constant 0 : index
    %c0_1 = arith.constant 0 : index
    %0 = vector.load %arg2[%c0, %c0_0, %c0_1] : memref<1x4x256xf32, #tpu.memory_space<vmem>>, vector<1x4x256xf32>
    %1 = vector.shape_cast %0 : vector<1x4x256xf32> to vector<4x256xf32>
    %c0_2 = arith.constant 0 : index
    %c0_3 = arith.constant 0 : index
    %2 = vector.load %arg5[%c0_2, %c0_3] : memref<32x4xf32, #tpu.memory_space<vmem>>, vector<32x4xf32>
    %cst = arith.constant dense<0.000000e+00> : vector<32x256xf32>
    %3 = tpu.matmul %2, %1, %cst {dimension_numbers = #tpu.dot_dimension_numbers<[1], [0], [0], [1], [0, 0, 1, 1], [], []>} : vector<32x4xf32>, vector<4x256xf32>, vector<32x256xf32> -> vector<32x256xf32>
    %c0_4 = arith.constant 0 : index
    %c0_5 = arith.constant 0 : index
    %4 = vector.load %arg6[%c0_4, %c0_5] : memref<32x1xf32, #tpu.memory_space<vmem>>, vector<32x1xf32>
    %5 = vector.broadcast %4 : vector<32x1xf32> to vector<32x256xf32>
    %6 = arith.addf %3, %5 : vector<32x256xf32>
    %cst_6 = arith.constant 0.000000e+00 : f32
    %7 = vector.broadcast %cst_6 : f32 to vector<32x256xf32>
    %8 = arith.maximumf %6, %7 : vector<32x256xf32>
    %c0_7 = arith.constant 0 : index
    %c0_8 = arith.constant 0 : index
    %9 = vector.load %arg7[%c0_7, %c0_8] : memref<32x32xf32, #tpu.memory_space<vmem>>, vector<32x32xf32>
    %cst_9 = arith.constant dense<0.000000e+00> : vector<32x256xf32>
    %10 = tpu.matmul %9, %8, %cst_9 {dimension_numbers = #tpu.dot_dimension_numbers<[1], [0], [0], [1], [0, 0, 1, 1], [], []>} : vector<32x32xf32>, vector<32x256xf32>, vector<32x256xf32> -> vector<32x256xf32>
    %c0_10 = arith.constant 0 : index
    %c0_11 = arith.constant 0 : index
    %11 = vector.load %arg8[%c0_10, %c0_11] : memref<32x1xf32, #tpu.memory_space<vmem>>, vector<32x1xf32>
    %12 = vector.broadcast %11 : vector<32x1xf32> to vector<32x256xf32>
    %13 = arith.addf %10, %12 : vector<32x256xf32>
    %cst_12 = arith.constant 0.000000e+00 : f32
    %14 = vector.broadcast %cst_12 : f32 to vector<32x256xf32>
    %15 = arith.maximumf %13, %14 : vector<32x256xf32>
    %c0_13 = arith.constant 0 : index
    %c0_14 = arith.constant 0 : index
    %c0_15 = arith.constant 0 : index
    %16 = vector.load %arg3[%c0_13, %c0_14, %c0_15] : memref<1x8x32xf32, #tpu.memory_space<vmem>>, vector<1x8x32xf32>
    %17 = vector.shape_cast %16 : vector<1x8x32xf32> to vector<8x32xf32>
    %cst_16 = arith.constant dense<0.000000e+00> : vector<8x256xf32>
    %18 = tpu.matmul %17, %15, %cst_16 {dimension_numbers = #tpu.dot_dimension_numbers<[1], [0], [0], [1], [0, 0, 1, 1], [], []>} : vector<8x32xf32>, vector<32x256xf32>, vector<8x256xf32> -> vector<8x256xf32>
    %cst_17 = arith.constant dense<0xFF800000> : vector<256xf32>
    %19 = vector.multi_reduction <maximumf>, %18, %cst_17 [0] : vector<8x256xf32> to vector<256xf32>
    %20 = vector.shape_cast %19 : vector<256xf32> to vector<1x256xf32>
    %21 = vector.broadcast %20 : vector<1x256xf32> to vector<8x256xf32>
    %22 = arith.subf %18, %21 : vector<8x256xf32>
    %23 = math.exp %22 : vector<8x256xf32>
    %cst_18 = arith.constant dense<0.000000e+00> : vector<256xf32>
    %24 = vector.multi_reduction <add>, %23, %cst_18 [0] : vector<8x256xf32> to vector<256xf32>
    %25 = vector.shape_cast %24 : vector<256xf32> to vector<1x256xf32>
    %26 = tpu.reciprocal %25 {approx = true} : vector<1x256xf32> -> vector<1x256xf32>
    %27 = arith.mulf %25, %26 : vector<1x256xf32>
    %cst_19 = arith.constant 2.000000e+00 : f32
    %28 = vector.broadcast %cst_19 : f32 to vector<1x256xf32>
    %29 = arith.subf %28, %27 : vector<1x256xf32>
    %30 = arith.mulf %26, %29 : vector<1x256xf32>
    %31 = vector.broadcast %30 : vector<1x256xf32> to vector<8x256xf32>
    %32 = arith.mulf %23, %31 : vector<8x256xf32>
    %c0_20 = arith.constant 0 : index
    %c0_21 = arith.constant 0 : index
    %c0_22 = arith.constant 0 : index
    %33 = vector.load %arg4[%c0_20, %c0_21, %c0_22] : memref<1x32x8xf32, #tpu.memory_space<vmem>>, vector<1x32x8xf32>
    %34 = vector.shape_cast %33 : vector<1x32x8xf32> to vector<32x8xf32>
    %cst_23 = arith.constant dense<0.000000e+00> : vector<32x256xf32>
    %35 = tpu.matmul %34, %32, %cst_23 {dimension_numbers = #tpu.dot_dimension_numbers<[1], [0], [0], [1], [0, 0, 1, 1], [], []>} : vector<32x8xf32>, vector<8x256xf32>, vector<32x256xf32> -> vector<32x256xf32>
    %c0_24 = arith.constant 0 : index
    %c0_25 = arith.constant 0 : index
    %36 = vector.load %arg9[%c0_24, %c0_25] : memref<32x32xf32, #tpu.memory_space<vmem>>, vector<32x32xf32>
    %cst_26 = arith.constant dense<0.000000e+00> : vector<32x256xf32>
    %37 = tpu.matmul %36, %35, %cst_26 {dimension_numbers = #tpu.dot_dimension_numbers<[1], [0], [0], [1], [0, 0, 1, 1], [], []>} : vector<32x32xf32>, vector<32x256xf32>, vector<32x256xf32> -> vector<32x256xf32>
    %c0_27 = arith.constant 0 : index
    %c0_28 = arith.constant 0 : index
    %38 = vector.load %arg10[%c0_27, %c0_28] : memref<32x1xf32, #tpu.memory_space<vmem>>, vector<32x1xf32>
    %39 = vector.broadcast %38 : vector<32x1xf32> to vector<32x256xf32>
    %40 = arith.addf %37, %39 : vector<32x256xf32>
    %cst_29 = arith.constant 0.000000e+00 : f32
    %41 = vector.broadcast %cst_29 : f32 to vector<32x256xf32>
    %42 = arith.maximumf %40, %41 : vector<32x256xf32>
    %c0_30 = arith.constant 0 : index
    %c0_31 = arith.constant 0 : index
    %c0_32 = arith.constant 0 : index
    %43 = vector.load %arg11[%c0_30, %c0_31, %c0_32] : memref<1x32x256xf32, #tpu.memory_space<vmem>>, vector<1x32x256xf32>
    %44 = vector.shape_cast %43 : vector<1x32x256xf32> to vector<32x256xf32>
    %45 = vector.shape_cast %42 : vector<32x256xf32> to vector<1x32x256xf32>
    tpu.vector_store %arg11[%c0_30, %c0_31, %c0_32], %45 {strides = array<i32>} : memref<1x32x256xf32, #tpu.memory_space<vmem>>, vector<1x32x256xf32>,
    return
  }
  func.func @transform_0(%arg0: i32, %arg1: i32) -> (i32, i32, i32) {
    %c0_i32 = arith.constant 0 : i32
    %c0_i32_0 = arith.constant 0 : i32
    return %arg0, %c0_i32, %arg1 : i32, i32, i32
  }
  func.func @transform_1(%arg0: i32, %arg1: i32) -> (i32, i32, i32) {
    %c0_i32 = arith.constant 0 : i32
    %c0_i32_0 = arith.constant 0 : i32
    %c0_i32_1 = arith.constant 0 : i32
    return %arg0, %c0_i32, %c0_i32_0 : i32, i32, i32
  }
  func.func @transform_2(%arg0: i32, %arg1: i32) -> (i32, i32, i32) {
    %c0_i32 = arith.constant 0 : i32
    %c0_i32_0 = arith.constant 0 : i32
    %c0_i32_1 = arith.constant 0 : i32
    return %arg0, %c0_i32, %c0_i32_0 : i32, i32, i32
  }
  func.func @transform_3(%arg0: i32, %arg1: i32) -> (i32, i32) {
    %c0_i32 = arith.constant 0 : i32
    %c0_i32_0 = arith.constant 0 : i32
    %c0_i32_1 = arith.constant 0 : i32
    return %c0_i32, %c0_i32_0 : i32, i32
  }
  func.func @transform_4(%arg0: i32, %arg1: i32) -> (i32, i32) {
    %c0_i32 = arith.constant 0 : i32
    %c0_i32_0 = arith.constant 0 : i32
    %c0_i32_1 = arith.constant 0 : i32
    return %c0_i32, %c0_i32_0 : i32, i32
  }
  func.func @transform_5(%arg0: i32, %arg1: i32) -> (i32, i32) {
    %c0_i32 = arith.constant 0 : i32
    %c0_i32_0 = arith.constant 0 : i32
    %c0_i32_1 = arith.constant 0 : i32
    return %c0_i32, %c0_i32_0 : i32, i32
  }
  func.func @transform_6(%arg0: i32, %arg1: i32) -> (i32, i32) {
    %c0_i32 = arith.constant 0 : i32
    %c0_i32_0 = arith.constant 0 : i32
    %c0_i32_1 = arith.constant 0 : i32
    return %c0_i32, %c0_i32_0 : i32, i32
  }
  func.func @transform_7(%arg0: i32, %arg1: i32) -> (i32, i32) {
    %c0_i32 = arith.constant 0 : i32
    %c0_i32_0 = arith.constant 0 : i32
    %c0_i32_1 = arith.constant 0 : i32
    return %c0_i32, %c0_i32_0 : i32, i32
  }
  func.func @transform_8(%arg0: i32, %arg1: i32) -> (i32, i32) {
    %c0_i32 = arith.constant 0 : i32
    %c0_i32_0 = arith.constant 0 : i32
    %c0_i32_1 = arith.constant 0 : i32
    return %c0_i32, %c0_i32_0 : i32, i32
  }
  func.func @transform_9(%arg0: i32, %arg1: i32) -> (i32, i32, i32) {
    %c0_i32 = arith.constant 0 : i32
    %c0_i32_0 = arith.constant 0 : i32
    return %arg0, %c0_i32, %arg1 : i32, i32, i32
  }
}

</mosaic_0001>

<bundles_post_ra>
// kernel: tpu_custom_call.1
= control target key start
LH: loop header
LB: loop body
LE: loop exit
PB: predicated region body
PF: predicated region fallthrough
CT: control target
= control target key end

     0   :  { %14 = vsyncpa [#allocation3], 0  ;;  %s1498_s0 = inlined_call_operand.vmem [shape: f32[2,4,256], index: 0, kind: input, shape index: {}]   ;;  %s1499_s1 = inlined_call_operand.vmem [shape: f32[2,8,32], index: 1, kind: input, shape index: {}]   ;;  %s1500_s2 = inlined_call_operand.vmem [shape: f32[2,32,8], index: 2, kind: input, shape index: {}]   ;;  %s1501_s3 = inlined_call_operand.vmem [shape: f32[32,4], index: 3, kind: input, shape index: {}]   ;;  %s1502_s4 = inlined_call_operand.vmem [shape: f32[32,1], index: 4, kind: input, shape index: {}]   ;;  %s1503_s5 = inlined_call_operand.vmem [shape: f32[32,32], index: 5, kind: input, shape index: {}]   ;;  %s1504_s6 = inlined_call_operand.vmem [shape: f32[32,1], index: 6, kind: input, shape index: {}]   ;;  %s1505_s7 = inlined_call_operand.vmem [shape: f32[32,32], index: 7, kind: input, shape index: {}]   ;;  %s1506_s8 = inlined_call_operand.vmem [shape: f32[32,1], index: 8, kind: input, shape index: {}]   ;;  %s1507_s9 = inlined_call_operand.hbm [shape: f32[2,32,256], index: 9, kind: output, shape index: {}]  }
   0x1   :  { %16 = vsyncpa [#allocation3 + $0x1], 0  ;;  %s1274_s30 = smov 0   ;;  %s1276_s10 = smov 0  }
   0x2   :  { %s1278_s11 = smov 0   ;;  %s1280_s12 = smov 0  }
   0x3   :  { %s1282_s13 = smov 0   ;;  %s1284_s14 = smov 0  }
   0x4 LB: > { %s1017_s15 = sadd.s32 4294967295, %s1219_s14   ;;  %s1018_s16 = sadd.s32 4294967294, %s1219_s14   ;;  %s1219_s14 = sphi %s1284_s14, %s22_s14   ;;  %s1215_s13 = sphi %s1282_s13, %s1514_s13   ;;  %s1211_s12 = sphi %s1280_s12, %s1513_s12   ;;  %s1207_s11 = sphi %s1278_s11, %s1512_s11   ;;  %s1203_s10 = sphi %s1276_s10, %s1511_s10   ;;  %s1199_s30 = sphi %s1274_s30, %s1510_s30  }
   0x5   : > { %s34_s17 = sadd.s32 1, %s1215_s13  ;;  %s249_s18 = sadd.s32 1, %s1207_s11 }
   0x6   : > { %p36_p0 = scmp.ge.s32.totalorder %s34_s17, 2  ;;  %p259_p1 = scmp.ne.s32.totalorder %s1207_s11, %s1203_s10 }
   0x7   : > { %p260_p2 = scmp.eq.s32.totalorder %s1017_s15, 1  ;;  %p265_p3 = scmp.ne.s32.totalorder %s1203_s10, %s1199_s30 }
   0x8   : > { %s1516_s17 = smov (%p36_p0, %s34_s17), 0  ;;  %p266_p5 = scmp.eq.s32.totalorder %s1018_s16, 1 }
   0x9   : > { %p1314_p4 = por %p260_p2, %p259_p1  ;;  %s244_s20 = ssub.s32 %s1215_s13, %s1516_s17 }
   0xa   : > { %p1021_p6 = scmp.ge.s32.totalorder %s1219_s14, 1  ;;  %p247_p7 = scmp.eq.s32.totalorder %s244_s20, 0 }
   0xb   : > { %p1321_p8 = por %p266_p5, %p265_p3  ;;  %p330_p9 = scmp.lt.s32.totalorder %s1219_s14, 3 }
   0xc   : > { %s1327_s22 = scalar_select %p247_p7, %s1207_s11, %s249_s18  }
   0xd   : > { %p331_p10 = pnand %p1021_p6, %p330_p9 }
   0xe   : > { %p380_p11 = scmp.lt.s32.totalorder (!%p331_p10), %s1211_s12, 1  ;;  %s376_s24 = sand.u32 (!%p331_p10), 1, %s1203_s10  }
   0xf   : > { %334 = sbr.rel (%p331_p10) target bundleno = 861 (0x35d), region = 56  ;;  %s1022_s25 = sshll.u32 (!%p331_p10), %s376_s24, 6 }
  0x10   : > { %s1161_s29 = scalar_lea.hbm (!%p331_p10), %s1507_s9, 128 }
  0x14   : > { %v405_v0 = vld [vmem:[%s1502_s4 + $0x8] sm:$0xff]  ;;  %v1221_v1 = vmov 0   ;;  %v407_v2 = vld [vmem:[%s1502_s4 + $0x18] sm:$0xff]  ;;  %s1337_s27 = scalar_select %p380_p11, %s1211_s12, 1  ;;  %v404_v4 = vld [vmem:[%s1502_s4] sm:$0xff]  ;;  %vm445_vm0 = vcmask 1043456  }
  0x15   : > { %1131 = vset.pattern.permute.xlu1 %v1221_v1  ;;  %1130 = vset.pattern.permute.xlu0 %v1221_v1  ;;  %v406_v5 = vld [vmem:[%s1502_s4 + $0x10] sm:$0xff]  ;;  %v400_v6 = vld [vmem:[%s1501_s3] sm:$0xff]  ;;  %vm432_vm1 = vcmask 31744   ;;  %v521_v9 = vld [vmem:[%s1504_s6 + $0x8] sm:$0xff]  ;;  %vm544_vm2 = vcmask 261120   ;;  %vm711_vm3 = vcmask 64512  }
  0x16   : > { %415 = vperm.xlu1 %1131, %v405_v0   ;;  %425 = vperm.xlu0 %1130, %v407_v2   ;;  %s1069_s28 = sshll.u32 %s1337_s27, 3  ;;  %v520_v10 = vld [vmem:[%s1504_s6] sm:$0xff]  ;;  %v401_v11 = vld [vmem:[%s1501_s3 + $0x8] sm:$0xff]  ;;  %v788_v13 = vld [vmem:[%s1506_s8 + $0x10] sm:$0xff] }
  0x17   : > { %1132 = vset.pattern.permute.xlu2 %v1221_v1  ;;  %s387_s16 = scalar_lea.vmem %s1498_s0, %s1069_s28  ;;  %v787_v12 = vld [vmem:[%s1506_s8 + $0x8] sm:$0xff]  ;;  %v402_v14 = vld [vmem:[%s1501_s3 + $0x10] sm:$0xff]  ;;  %v403_v15 = vld [vmem:[%s1501_s3 + $0x18] sm:$0xff]  ;;  %s392_s23 = scalar_lea.vmem %s1499_s1, %s1069_s28 }
  0x18   : > { %v399_v3 = vld [vmem:[%s387_s16] sm:$0xff]  ;;  %v523_v36 = vld [vmem:[%s1504_s6 + $0x18] sm:$0xff]  ;;  %v522_v46 = vld [vmem:[%s1504_s6 + $0x10] sm:$0xff]  ;;  %s1070_s28 = sshll.u32 %s1337_s27, 5  ;;  %s1071_s27 = sshll.u32 %s1211_s12, 6 }
  0x19   : > { %429 = vst [vmem:[#allocation1] ss:$2 sm:$0xff] %v399_v3  ;;  %541 = vperm.xlu2 %1132, %v523_v36   ;;  %v516_v45 = vld [vmem:[%s1503_s5] sm:$0xff]  ;;  %v517_v47 = vld [vmem:[%s1503_s5 + $0x8] sm:$0xff]  ;;  %v518_v49 = vld [vmem:[%s1503_s5 + $0x10] sm:$0xff]  ;;  %s397_s26 = scalar_lea.vmem %s1500_s2, %s1070_s28  ;;  %s910_s16 = scalar_lea.hbm %s1507_s9, %s1071_s27 }
  0x1a   : > { %v786_v48 = vld [vmem:[%s1506_s8] sm:$0xff]  ;;  %v789_v50 = vld [vmem:[%s1506_s8 + $0x18] sm:$0xff]  ;;  %s913_s20 = sshll.u32 %s910_s16, 4  ;;  %s897_s12 = scalar_lea.sflag [#allocation3], %s376_s24  ;;  %s914_s20 = int_to_ptr.hbm [resolvable:$true] %s913_s20 }
  0x1b   : > { %v519_v51 = vld [vmem:[%s1503_s5 + $0x18] sm:$0xff] }
  0x1e   : > { %410 = vperm.xlu1 %1131, %v404_v4   ;;  %420 = vperm.xlu0 %1130, %v406_v5  }
  0x20   : > { %v430_v7 = vld.sshfl [vmem:[#allocation1] sm:$0xff pattern:$0x75316420]  ;;  %v431_v8 = vld.sshfl [vmem:[#allocation1 + $0x8] sm:$0xff pattern:$0x75316420] }
  0x21   : > { %1028 = vmatpush.msk.msra.mxu0 %vm445_vm0, %v430_v7  ;;  %1033 = vmatpush.msk.msra.mxu1 %vm445_vm0, %v431_v8 }
  0x22   : > { %1029 = vmatmul.msk.f32.vlgmr.msra.gmra.mxu0 %vm432_vm1, %v400_v6  ;;  %1034 = vmatmul.msk.f32.vlgmr.msra.gmra.mxu1 %vm432_vm1, %v400_v6 }
  0x23   : > { %536 = vperm.xlu2 %1132, %v522_v46  }
  0x26   : > { %531 = vperm.xlu0 %1130, %v521_v9   ;;  %526 = vperm.xlu1 %1131, %v520_v10  }
  0x2a   : > { %1030 = vmatmul.msk.f32.gmra.mxu0 %vm432_vm1, %v401_v11  ;;  %1035 = vmatmul.msk.f32.gmra.mxu1 %vm432_vm1, %v401_v11 }
  0x2b   : > { %792 = vperm.xlu2 %1132, %v786_v48  }
  0x2e   : > { %797 = vperm.xlu0 %1130, %v787_v12   ;;  %802 = vperm.xlu1 %1131, %v788_v13  }
  0x32   : > { %1031 = vmatmul.msk.f32.gmra.mxu0 %vm432_vm1, %v402_v14  ;;  %1036 = vmatmul.msk.f32.gmra.mxu1 %vm432_vm1, %v402_v14 }
  0x33   : > { %807 = vperm.xlu2 %1132, %v789_v50  }
  0x3a   : > { %1032 = vmatmul.msk.f32.gmra.mxu0 %vm432_vm1, %v403_v15  ;;  %1037 = vmatmul.msk.f32.gmra.mxu1 %vm432_vm1, %v403_v15 }
  0x73   : > { %v542_v56 = vpop.permute.xlu2 %541 }
  0x7d   : > { %v537_v59 = vpop.permute.xlu2 %536 }
  0x88   : > { %v426_v20 = vpop.permute.xlu0 %425  ;;  %v416_v21 = vpop.permute.xlu1 %415 }
  0x90   : > { %v421_v24 = vpop.permute.xlu0 %420  ;;  %v411_v31 = vpop.permute.xlu1 %410 }
  0x98   : > { %v532_v2 = vpop.permute.xlu0 %531  ;;  %v527_v7 = vpop.permute.xlu1 %526 }
  0x9f   : > { %v467_v16 = vpop.f32.mrf.mxu0  ;;  %v496_v17 = vpop.f32.mrf.mxu1 }
  0xa0   : > { %v468_v37 = vadd.f32 %v467_v16, %v411_v31  ;;  %v497_v38 = vadd.f32 %v496_v17, %v411_v31  ;;  %v623_v16 = vld [vmem:[%s392_s23] sm:$0xff]  ;;  %s1155_s23 = sshra.s32 %s914_s20, 4  ;;  %s1156_s23 = int_to_ptr.hbm [resolvable:$true] %s1155_s23 }
  0xa1   : > { %s1157_s28 = scalar_lea.hbm %s1156_s23, 64  ;;  %p1162_p1 = scmp.lt.s32.totalorder %s1156_s23, %s1507_s9 }
  0xa2   : > { %v508_v43 = vmax.f32 %v468_v37, 0.0  ;;  %v509_v44 = vmax.f32 %v497_v38, 0.0  ;;  %p1158_p12 = scmp.ne.s32.totalorder %s1156_s23, %s1157_s28  ;;  %p1163_p2 = scmp.lt.s32.totalorder %s1161_s29, %s1157_s28 }
  0xa4   : > { %p1159_p13 = pnand %p1158_p12, %p1314_p4  ;;  %p1164_p3 = por %p1163_p2, %p1162_p1 }
  0xa6   : > { %p1160_p0 = pneg %p1159_p13 }
  0xa7   : > { %v470_v18 = vpop.f32.mrf.mxu0  ;;  %v499_v19 = vpop.f32.mrf.mxu1 }
  0xa8   : > { %v471_v32 = vadd.f32 %v470_v18, %v416_v21  ;;  %v500_v33 = vadd.f32 %v499_v19, %v416_v21  ;;  %p1165_p5 = pnand %p1164_p3, %p1160_p0 }
  0xaa   : > { %v510_v41 = vmax.f32 %v471_v32, 0.0  ;;  %v511_v42 = vmax.f32 %v500_v33, 0.0 }
  0xaf   : > { %v473_v22 = vpop.f32.mrf.mxu0  ;;  %v502_v23 = vpop.f32.mrf.mxu1 }
  0xb0   : > { %v474_v27 = vadd.f32 %v473_v22, %v421_v24  ;;  %v503_v28 = vadd.f32 %v502_v23, %v421_v24 }
  0xb2   : > { %v512_v39 = vmax.f32 %v474_v27, 0.0  ;;  %v513_v40 = vmax.f32 %v503_v28, 0.0 }
  0xb7   : > { %v476_v25 = vpop.f32.mrf.mxu0  ;;  %v505_v26 = vpop.f32.mrf.mxu1 }
  0xb8   : > { %v477_v29 = vadd.f32 %v476_v25, %v426_v20  ;;  %v506_v30 = vadd.f32 %v505_v26, %v426_v20 }
  0xba   : > { %v514_v34 = vmax.f32 %v477_v29, 0.0  ;;  %v515_v35 = vmax.f32 %v506_v30, 0.0 }
  0xbc   : > { %569 = vmatpush.msra.mxu2 %v514_v34  ;;  %598 = vmatpush.msra.mxu3 %v515_v35 }
  0xbe   : > { %570 = vmatpush.msra.mxu2 %v512_v39  ;;  %599 = vmatpush.msra.mxu3 %v513_v40 }
  0xc0   : > { %571 = vmatpush.msra.mxu2 %v510_v41  ;;  %600 = vmatpush.msra.mxu3 %v511_v42 }
  0xc2   : > { %572 = vmatpush.msra.mxu2 %v508_v43  ;;  %601 = vmatpush.msra.mxu3 %v509_v44 }
  0xc3   : > { %1038 = vmatmul.msk.f32.vlgmr.msra.gmra.mxu2 %vm544_vm2, %v516_v45  ;;  %1042 = vmatmul.msk.f32.vlgmr.msra.gmra.mxu3 %vm544_vm2, %v516_v45 }
  0xcb   : > { %1039 = vmatmul.msk.f32.gmra.mxu2 %vm544_vm2, %v517_v47  ;;  %1043 = vmatmul.msk.f32.gmra.mxu3 %vm544_vm2, %v517_v47 }
  0xd3   : > { %1040 = vmatmul.msk.f32.gmra.mxu2 %vm544_vm2, %v518_v49  ;;  %1044 = vmatmul.msk.f32.gmra.mxu3 %vm544_vm2, %v518_v49 }
  0xdb   : > { %1041 = vmatmul.msk.f32.gmra.mxu2 %vm544_vm2, %v519_v51  ;;  %1045 = vmatmul.msk.f32.gmra.mxu3 %vm544_vm2, %v519_v51 }
 0x146   : > { %v574_v52 = vpop.f32.mrf.mxu2  ;;  %v603_v53 = vpop.f32.mrf.mxu3 }
 0x147   : > { %v575_v8 = vadd.f32 %v574_v52, %v527_v7  ;;  %v604_v9 = vadd.f32 %v603_v53, %v527_v7  ;;  %v782_v7 = vld [vmem:[%s1505_s7] sm:$0xff] }
 0x149   : > { %v615_v14 = vmax.f32 %v575_v8, 0.0  ;;  %v616_v15 = vmax.f32 %v604_v9, 0.0  ;;  %v783_v8 = vld [vmem:[%s1505_s7 + $0x8] sm:$0xff]  ;;  %v784_v9 = vld [vmem:[%s1505_s7 + $0x10] sm:$0xff] }
 0x14e   : > { %v577_v54 = vpop.f32.mrf.mxu2  ;;  %v606_v55 = vpop.f32.mrf.mxu3 }
 0x14f   : > { %v578_v3 = vadd.f32 %v577_v54, %v532_v2  ;;  %v607_v4 = vadd.f32 %v606_v55, %v532_v2 }
 0x151   : > { %v617_v12 = vmax.f32 %v578_v3, 0.0  ;;  %v618_v13 = vmax.f32 %v607_v4, 0.0 }
 0x156   : > { %v580_v57 = vpop.f32.mrf.mxu2  ;;  %v609_v58 = vpop.f32.mrf.mxu3 }
 0x157   : > { %v581_v62 = vadd.f32 %v580_v57, %v537_v59  ;;  %v610_v63 = vadd.f32 %v609_v58, %v537_v59  ;;  %v707_v58 = vld [vmem:[%s397_s26] sm:$0xff] }
 0x159   : > { %v619_v10 = vmax.f32 %v581_v62, 0.0  ;;  %v620_v11 = vmax.f32 %v610_v63, 0.0  ;;  %v710_v62 = vld [vmem:[%s397_s26 + $0x18] sm:$0xff] }
 0x15e   : > { %v583_v60 = vpop.f32.mrf.mxu2  ;;  %v612_v61 = vpop.f32.mrf.mxu3 }
 0x15f   : > { %v584_v0 = vadd.f32 %v583_v60, %v542_v56  ;;  %v613_v1 = vadd.f32 %v612_v61, %v542_v56  ;;  %v708_v60 = vld [vmem:[%s397_s26 + $0x8] sm:$0xff]  ;;  %v709_v61 = vld [vmem:[%s397_s26 + $0x10] sm:$0xff]  ;;  %s1449_s26 = scalar_lea.vmem [#allocation2], %s1022_s25 }
 0x160   : > { %s911_s18 = sshll.u32 %s1449_s26, 4  ;;  %s912_s18 = int_to_ptr.vmem [resolvable:$true] %s911_s18 }
 0x161   : > { %v621_v5 = vmax.f32 %v584_v0, 0.0  ;;  %v622_v6 = vmax.f32 %v613_v1, 0.0 }
 0x163   : > { %639 = vmatpush.msrb.mxu0 %v621_v5  ;;  %659 = vmatpush.msrb.mxu1 %v622_v6 }
 0x165   : > { %640 = vmatpush.msrb.mxu0 %v619_v10  ;;  %660 = vmatpush.msrb.mxu1 %v620_v11  ;;  %v785_v10 = vld [vmem:[%s1505_s7 + $0x18] sm:$0xff]  ;;  %v793_v11 = vpop.permute.xlu2 %792 }
 0x167   : > { %641 = vmatpush.msrb.mxu0 %v617_v12  ;;  %661 = vmatpush.msrb.mxu1 %v618_v13 }
 0x169   : > { %642 = vmatpush.msrb.mxu0 %v615_v14  ;;  %662 = vmatpush.msrb.mxu1 %v616_v15 }
 0x16a   : > { %1046 = vmatmul.msk.f32.vlgmr.msrb.gmra.mxu0 %vm544_vm2, %v623_v16  ;;  %1047 = vmatmul.msk.f32.vlgmr.msrb.gmra.mxu1 %vm544_vm2, %v623_v16 }
 0x1e7   : > { %v644_v17 = vpop.f32.mrf.mxu0  ;;  %v664_v18 = vpop.f32.mrf.mxu1 }
 0x1e8   : > { %v667_v19 = vrot.slane %v644_v17, 4  ;;  %v673_v20 = vrot.slane %v664_v18, 4 }
 0x1ea   : > { %v668_v21 = vmax.f32 %v644_v17, %v667_v19  ;;  %v674_v22 = vmax.f32 %v664_v18, %v673_v20 }
 0x1ec   : > { %v669_v23 = vrot.slane %v668_v21, 2  ;;  %v675_v24 = vrot.slane %v674_v22, 2 }
 0x1ee   : > { %v670_v25 = vmax.f32 %v668_v21, %v669_v23  ;;  %v676_v26 = vmax.f32 %v674_v22, %v675_v24 }
 0x1f0   : > { %v671_v27 = vrot.slane %v670_v25, 1  ;;  %v677_v28 = vrot.slane %v676_v26, 1 }
 0x1f2   : > { %v672_v29 = vmax.f32 %v670_v25, %v671_v27  ;;  %v678_v30 = vmax.f32 %v676_v26, %v677_v28  ;;  %v803_v25 = vpop.permute.xlu1 %802 }
 0x1f4   : > { %v679_v31 = vsub.f32 %v644_v17, %v672_v29  ;;  %v680_v32 = vsub.f32 %v664_v18, %v678_v30  ;;  %v798_v18 = vpop.permute.xlu0 %797 }
 0x1f6   : > { %v681_v33 = vmul.f32 1.442695, %v679_v31  ;;  %v683_v34 = vmul.f32 1.442695, %v680_v32  ;;  %v808_v32 = vpop.permute.xlu2 %807 }
 0x1f8   : > { %1133 = vpow2.f32 %v681_v33 }
 0x1f9   : > { %1135 = vpow2.f32 %v683_v34 }
 0x1fe   : > { %v1134_v35 = vpop.eup %1133 }
 0x1ff   : > { %v1136_v36 = vpop.eup %1135  ;;  %v685_v37 = vrot.slane %v1134_v35, 4 }
 0x200   : > { %v691_v38 = vrot.slane %v1136_v36, 4 }
 0x201   : > { %v686_v39 = vadd.f32 %v1134_v35, %v685_v37 }
 0x202   : > { %v692_v40 = vadd.f32 %v1136_v36, %v691_v38 }
 0x203   : > { %v687_v41 = vrot.slane %v686_v39, 2 }
 0x204   : > { %v693_v42 = vrot.slane %v692_v40, 2 }
 0x205   : > { %v688_v43 = vadd.f32 %v687_v41, %v686_v39 }
 0x206   : > { %v694_v44 = vadd.f32 %v693_v42, %v692_v40 }
 0x207   : > { %v689_v45 = vrot.slane %v688_v43, 1 }
 0x208   : > { %v695_v46 = vrot.slane %v694_v44, 1 }
 0x209   : > { %v690_v47 = vadd.f32 %v689_v45, %v688_v43 }
 0x20a   : > { %v696_v48 = vadd.f32 %v695_v46, %v694_v44 }
 0x20b   : > { %1137 = vrcp.f32 %v690_v47 }
 0x20c   : > { %1139 = vrcp.f32 %v696_v48 }
 0x211   : > { %v1138_v49 = vpop.eup %1137 }
 0x212   : > { %v1140_v50 = vpop.eup %1139  ;;  %v699_v51 = vmul.f32 %v1138_v49, %v690_v47 }
 0x213   : > { %v700_v52 = vmul.f32 %v1140_v50, %v696_v48 }
 0x214   : > { %v701_v53 = vsub.f32 2.0, %v699_v51 }
 0x215   : > { %v702_v54 = vsub.f32 2.0, %v700_v52 }
 0x216   : > { %v703_v55 = vmul.f32 %v1138_v49, %v701_v53 }
 0x217   : > { %v704_v56 = vmul.f32 %v1140_v50, %v702_v54 }
 0x218   : > { %v705_v57 = vmul.f32 %v1134_v35, %v703_v55 }
 0x219   : > { %v706_v59 = vmul.f32 %v1136_v36, %v704_v56 }
 0x21a   : > { %739 = vmatpush.msrb.mxu2 %v705_v57 }
 0x21b   : > { %768 = vmatpush.msrb.mxu3 %v706_v59  ;;  %1048 = vmatmul.msk.f32.vlgmr.msrb.gmra.mxu2 %vm711_vm3, %v707_v58 }
 0x21c   : > { %1052 = vmatmul.msk.f32.vlgmr.msrb.gmra.mxu3 %vm711_vm3, %v707_v58 }
 0x223   : > { %1049 = vmatmul.msk.f32.gmra.mxu2 %vm711_vm3, %v708_v60 }
 0x224   : > { %1053 = vmatmul.msk.f32.gmra.mxu3 %vm711_vm3, %v708_v60 }
 0x22b   : > { %1050 = vmatmul.msk.f32.gmra.mxu2 %vm711_vm3, %v709_v61 }
 0x22c   : > { %1054 = vmatmul.msk.f32.gmra.mxu3 %vm711_vm3, %v709_v61 }
 0x233   : > { %1051 = vmatmul.msk.f32.gmra.mxu2 %vm711_vm3, %v710_v62 }
 0x234   : > { %1055 = vmatmul.msk.f32.gmra.mxu3 %vm711_vm3, %v710_v62 }
 0x29e   : > { %v741_v63 = vpop.f32.mrf.mxu2 }
 0x29f   : > { %v770_v0 = vpop.f32.mrf.mxu3 }
 0x2a6   : > { %v744_v1 = vpop.f32.mrf.mxu2 }
 0x2a7   : > { %v773_v2 = vpop.f32.mrf.mxu3 }
 0x2ae   : > { %v747_v3 = vpop.f32.mrf.mxu2 }
 0x2af   : > { %v776_v4 = vpop.f32.mrf.mxu3 }
 0x2b6   : > { %v750_v5 = vpop.f32.mrf.mxu2 }
 0x2b7   : > { %v779_v6 = vpop.f32.mrf.mxu3  ;;  %834 = vmatpush.msra.mxu0 %v750_v5 }
 0x2b8   : > { %863 = vmatpush.msra.mxu1 %v779_v6 }
 0x2b9   : > { %835 = vmatpush.msra.mxu0 %v747_v3 }
 0x2ba   : > { %864 = vmatpush.msra.mxu1 %v776_v4 }
 0x2bb   : > { %836 = vmatpush.msra.mxu0 %v744_v1 }
 0x2bc   : > { %865 = vmatpush.msra.mxu1 %v773_v2 }
 0x2bd   : > { %837 = vmatpush.msra.mxu0 %v741_v63 }
 0x2be   : > { %866 = vmatpush.msra.mxu1 %v770_v0  ;;  %1056 = vmatmul.msk.f32.vlgmr.msra.gmra.mxu0 %vm544_vm2, %v782_v7 }
 0x2bf   : > { %1060 = vmatmul.msk.f32.vlgmr.msra.gmra.mxu1 %vm544_vm2, %v782_v7 }
 0x2c6   : > { %1057 = vmatmul.msk.f32.gmra.mxu0 %vm544_vm2, %v783_v8 }
 0x2c7   : > { %1061 = vmatmul.msk.f32.gmra.mxu1 %vm544_vm2, %v783_v8 }
 0x2ce   : > { %1058 = vmatmul.msk.f32.gmra.mxu0 %vm544_vm2, %v784_v9 }
 0x2cf   : > { %1062 = vmatmul.msk.f32.gmra.mxu1 %vm544_vm2, %v784_v9 }
 0x2d6   : > { %1059 = vmatmul.msk.f32.gmra.mxu0 %vm544_vm2, %v785_v10 }
 0x2d7   : > { %1063 = vmatmul.msk.f32.gmra.mxu1 %vm544_vm2, %v785_v10 }
 0x33b   : > { %v839_v12 = vpop.f32.mrf.mxu0 }
 0x33c   : > { %v840_v13 = vadd.f32 %v839_v12, %v793_v11  ;;  %v868_v14 = vpop.f32.mrf.mxu1 }
 0x33d   : > { %v869_v15 = vadd.f32 %v868_v14, %v793_v11 }
 0x33e   : > { %v880_v16 = vmax.f32 %v840_v13, 0.0 }
 0x33f   : > { %v881_v17 = vmax.f32 %v869_v15, 0.0 }
 0x340   : > { %888 = vst [vmem:[%s1449_s26] sm:$0xff] %v880_v16 }
 0x341   : > { %889 = vst [vmem:[%s1449_s26 + $0x8] sm:$0xff] %v881_v17 }
 0x343   : > { %v842_v19 = vpop.f32.mrf.mxu0 }
 0x344   : > { %v843_v20 = vadd.f32 %v842_v19, %v798_v18  ;;  %v871_v21 = vpop.f32.mrf.mxu1 }
 0x345   : > { %v872_v22 = vadd.f32 %v871_v21, %v798_v18 }
 0x346   : > { %v882_v23 = vmax.f32 %v843_v20, 0.0 }
 0x347   : > { %v883_v24 = vmax.f32 %v872_v22, 0.0 }
 0x348   : > { %890 = vst [vmem:[%s1449_s26 + $0x10] sm:$0xff] %v882_v23 }
 0x349   : > { %891 = vst [vmem:[%s1449_s26 + $0x18] sm:$0xff] %v883_v24 }
 0x34b   : > { %v845_v26 = vpop.f32.mrf.mxu0 }
 0x34c   : > { %v846_v27 = vadd.f32 %v845_v26, %v803_v25  ;;  %v874_v28 = vpop.f32.mrf.mxu1 }
 0x34d   : > { %v875_v29 = vadd.f32 %v874_v28, %v803_v25 }
 0x34e   : > { %v884_v30 = vmax.f32 %v846_v27, 0.0 }
 0x34f   : > { %v885_v31 = vmax.f32 %v875_v29, 0.0 }
 0x350   : > { %892 = vst [vmem:[%s1449_s26 + $0x20] sm:$0xff] %v884_v30 }
 0x351   : > { %893 = vst [vmem:[%s1449_s26 + $0x28] sm:$0xff] %v885_v31 }
 0x353   : > { %v848_v33 = vpop.f32.mrf.mxu0 }
 0x354   : > { %v849_v34 = vadd.f32 %v848_v33, %v808_v32  ;;  %v877_v35 = vpop.f32.mrf.mxu1 }
 0x355   : > { %v878_v36 = vadd.f32 %v877_v35, %v808_v32 }
 0x356   : > { %v886_v37 = vmax.f32 %v849_v34, 0.0 }
 0x357   : > { %v887_v38 = vmax.f32 %v878_v36, 0.0 }
 0x358   : > { %894 = vst [vmem:[%s1449_s26 + $0x30] sm:$0xff] %v886_v37 }
 0x359   : > { %895 = vst [vmem:[%s1449_s26 + $0x38] sm:$0xff] %v887_v38 }
 0x35a   : > { %1168 = shalt.err (!%p1165_p5)
}
 0x35b   : > { %s1222_s24 = smov 256   ;;  %s1223_s26 = smov 16  }
 0x35c   : > { %1072 = dma.vmem_to_hbm [thread:$0]  (%p1314_p4), %s912_s18, 1024, %s914_s20, %s897_s12, %s1222_s24, %s1222_s24, %s1223_s26  }
 0x35d PF: > { %p1078_p6 = scmp.ge.s32.totalorder %s1219_s14, 2  ;;  %s928_s25 = sand.u32 1, %s1199_s30  }
 0x35e   : > { %s929_s27 = scalar_lea.sflag [#allocation3], %s928_s25 }
 0x35f   : > { %p1075_p7 = pnand %p1078_p6, %p1321_p8 }
 0x361   : > { %p1076_p9 = pneg %p1075_p7 }
 0x363   : > { %1194 = dma.done.wait (%p1076_p9), %s929_s27, 1024  }
 0x364   : > { %1196 = vsyncadd (%p1076_p9), %s929_s27, 4294966272  ;;  %s22_s14 = sadd.s32 1, %s1219_s14   ;;  %s1510_s30 = smov %s1203_s10 }
 0x365   : > { %p19_p10 = scmp.ge.s32.totalorder %s22_s14, 4   ;;  %s1511_s10 = smov %s1207_s11 }
 0x366   : > { %s1512_s11 = smov %s1327_s22  ;;  %s1513_s12 = smov %s1215_s13 }
 0x367   : > { %s1514_s13 = smov %s1516_s17  ;;  %21 = sbr.rel (!%p19_p10) target bundleno = 4 (0x4), region = 97 }
 0x36c   :  { %935 = vsyncpa [#allocation3], 1 }
 0x36d   :  { %937 = vsyncpa [#allocation3 + $0x1], 1 }

</bundles_post_ra>
